<compile_context>
chip_gen: v5e
topology: v5e:2x2
jax: 0.10.0
libtpu: 0.0.40
codegen_flags: <defaults>
</compile_context>

<pallas_src>
import jax
import jax.numpy as jnp
from jax.experimental import pallas as pl
from jax.experimental.pallas import tpu as pltpu

EPS = 1e-5
LANE = 128


def _round_up(v, m):
    return (v + m - 1) // m * m


def mlp_head_kernel(x_ref, w1_ref, b1_ref, gamma_ref, beta_ref, w2_ref, b2_ref,
                    o_ref, acc_ref):
    j = pl.program_id(0)

    # ---- Linear 1 on this hidden tile: (N, C_in) @ (C_in, tH) on the MXU ----
    # bf16 operands, f32 accumulation.
    h = jnp.dot(x_ref[...], w1_ref[...], preferred_element_type=jnp.float32)
    h = h + b1_ref[...]

    # ---- BatchNorm1d (training mode). Per-feature stats over the FULL batch
    # (N is un-tiled -> exact). One-pass stats + fused scale/shift. ----
    inv_n = 1.0 / h.shape[0]
    mean = jnp.sum(h, axis=0, keepdims=True) * inv_n
    ex2 = jnp.sum(h * h, axis=0, keepdims=True) * inv_n
    var = ex2 - mean * mean
    a = jax.lax.rsqrt(var + EPS) * gamma_ref[...]
    c = beta_ref[...] - mean * a

    # ---- fused BN affine + ReLU (VPU) ----
    h = jnp.maximum(h * a + c, 0.0)

    # ---- Linear 2 partial product, accumulated across hidden tiles ----
    @pl.when(j == 0)
    def _():
        acc_ref[...] = jnp.zeros_like(acc_ref)

    acc_ref[...] += jnp.dot(h.astype(w2_ref.dtype), w2_ref[...],
                            preferred_element_type=jnp.float32)

    @pl.when(j == pl.num_programs(0) - 1)
    def _():
        o_ref[...] = (acc_ref[...] + b2_ref[...]).astype(o_ref.dtype)


def mlp_head_forward(x, w1, b1, gamma, beta, w2, b2, *, h_tile=512):
    """x: (N, C_in) float32. Weights pre-transposed: w1 (C_in, H), w2 (H, C_out).
    Returns (N, C_out) float32."""
    n, c_in = x.shape
    h = w1.shape[1]
    c_out = w2.shape[1]

    # Lane-dense tiling: hidden tiles and padded C_out are multiples of 128.
    h_tile = min(h_tile, _round_up(h, LANE))
    h_p = _round_up(h, h_tile)
    c_out_p = _round_up(c_out, LANE)

    # Pad along H / C_out. Padded hidden features are exactly zero through
    # BN + ReLU (beta_pad = 0) and contribute nothing via zero w2 rows.
    w1_p = jnp.pad(w1, ((0, 0), (0, h_p - h)))
    b1_p = jnp.pad(b1, ((0, 0), (0, h_p - h)))
    gamma_p = jnp.pad(gamma, ((0, 0), (0, h_p - h)), constant_values=1.0)
    beta_p = jnp.pad(beta, ((0, 0), (0, h_p - h)))
    w2_p = jnp.pad(w2, ((0, h_p - h), (0, c_out_p - c_out)))
    b2_p = jnp.pad(b2, ((0, 0), (0, c_out_p - c_out)))

    # bf16 MXU operands; accumulation and BN math stay in f32.
    x_bf = x.astype(jnp.bfloat16)
    w1_bf = w1_p.astype(jnp.bfloat16)
    w2_bf = w2_p.astype(jnp.bfloat16)

    grid = (h_p // h_tile,)

    cost = pl.CostEstimate(
        flops=2 * n * (c_in * h_p + h_p * c_out_p),
        transcendentals=h_p,  # one rsqrt per hidden feature
        bytes_accessed=(n * c_in * 2 + c_in * h_p * 2 + h_p * c_out_p * 2
                        + 3 * h_p * 4 + c_out_p * 4 + n * c_out_p * 4),
    )

    out_p = pl.pallas_call(
        mlp_head_kernel,
        out_shape=jax.ShapeDtypeStruct((n, c_out_p), jnp.float32),
        grid_spec=pltpu.PrefetchScalarGridSpec(
            num_scalar_prefetch=0,
            grid=grid,
            in_specs=[
                pl.BlockSpec((n, c_in), lambda j: (0, 0)),           # x (VMEM-resident)
                pl.BlockSpec((c_in, h_tile), lambda j: (0, j)),      # w1 tile (streamed)
                pl.BlockSpec((1, h_tile), lambda j: (0, j)),         # b1 tile
                pl.BlockSpec((1, h_tile), lambda j: (0, j)),         # gamma tile
                pl.BlockSpec((1, h_tile), lambda j: (0, j)),         # beta tile
                pl.BlockSpec((h_tile, c_out_p), lambda j: (j, 0)),   # w2 tile (streamed)
                pl.BlockSpec((1, c_out_p), lambda j: (0, 0)),        # b2 (resident)
            ],
            out_specs=pl.BlockSpec((n, c_out_p), lambda j: (0, 0)),  # resident accumulator
            scratch_shapes=[pltpu.VMEM((n, c_out_p), jnp.float32)],
        ),
        compiler_params=pltpu.CompilerParams(
            dimension_semantics=("arbitrary",),   # hidden axis is a reduction for the output
            vmem_limit_bytes=48 * 1024 * 1024,    # fits v7x's 64 MiB physical with headroom
        ),
        cost_estimate=cost,
    )(x_bf, w1_bf, b1_p, gamma_p, beta_p, w2_bf, b2_p)

    return out_p[:, :c_out]


def init_params(key, in_channels, hidden_size, out_size):
    """Deterministic init mimicking torch.nn.Linear defaults (uniform +/- 1/sqrt(fan_in))."""
    k1, k2, k3, k4 = jax.random.split(key, 4)
    bound1 = 1.0 / (in_channels ** 0.5)
    bound2 = 1.0 / (hidden_size ** 0.5)
    # Stored already transposed for the kernel: (fan_in, fan_out).
    w1 = jax.random.uniform(k1, (in_channels, hidden_size), jnp.float32, -bound1, bound1)
    b1 = jax.random.uniform(k2, (1, hidden_size), jnp.float32, -bound1, bound1)
    gamma = jnp.ones((1, hidden_size), jnp.float32)   # BatchNorm1d weight init
    beta = jnp.zeros((1, hidden_size), jnp.float32)   # BatchNorm1d bias init
    w2 = jax.random.uniform(k3, (hidden_size, out_size), jnp.float32, -bound2, bound2)
    b2 = jax.random.uniform(k4, (1, out_size), jnp.float32, -bound2, bound2)
    return w1, b1, gamma, beta, w2, b2


def mlp_head_reference(x, w1, b1, gamma, beta, w2, b2):
    """Pure-JAX reference of the torch forward (training-mode BatchNorm1d),
    mimicking the kernel's bf16 MXU operands with f32 accumulation."""
    h = jnp.dot(x.astype(jnp.bfloat16), w1.astype(jnp.bfloat16),
                preferred_element_type=jnp.float32) + b1
    mean = jnp.mean(h, axis=0, keepdims=True)
    var = jnp.mean((h - mean) ** 2, axis=0, keepdims=True)  # biased, as torch BN uses
    h = (h - mean) * jax.lax.rsqrt(var + EPS) * gamma + beta
    h = jnp.maximum(h, 0.0)
    return jnp.dot(h.astype(jnp.bfloat16), w2.astype(jnp.bfloat16),
                   preferred_element_type=jnp.float32) + b2


if __name__ == "__main__":
    batch, in_channels, hidden_size, out_size = 8, 32, 256, 16

    key = jax.random.PRNGKey(0)
    kx, kp = jax.random.split(key)
    x = jax.random.normal(kx, (batch, in_channels), jnp.float32)
    params = init_params(kp, in_channels, hidden_size, out_size)

    # h_tile=128 -> grid of 2 hidden tiles (exercises streaming + accumulator path).
    out = mlp_head_forward(x, *params, h_tile=128)
    out = jax.block_until_ready(out)

    ref = mlp_head_reference(x, *params)
    assert out.shape == (batch, out_size)
    assert jnp.allclose(out, ref, atol=1e-2, rtol=1e-2), "mismatch vs reference"

    print("KERNEL_OK")
</pallas_src>

<mosaic_0001>
module attributes {stable_mosaic.version = 11 : i64} {
  func.func @mlp_head_kernel(%arg0: i32, %arg1: memref<8x32xbf16, #tpu.memory_space<vmem>>, %arg2: memref<32x128xbf16, #tpu.memory_space<vmem>>, %arg3: memref<1x128xf32, #tpu.memory_space<vmem>>, %arg4: memref<1x128xf32, #tpu.memory_space<vmem>>, %arg5: memref<1x128xf32, #tpu.memory_space<vmem>>, %arg6: memref<128x128xbf16, #tpu.memory_space<vmem>>, %arg7: memref<1x128xf32, #tpu.memory_space<vmem>>, %arg8: memref<8x128xf32, #tpu.memory_space<vmem>>, %arg9: memref<8x128xf32, #tpu.memory_space<vmem>>) attributes {dimension_semantics = [#tpu.dimension_semantics<arbitrary>], iteration_bounds = array<i64: 2>, scalar_prefetch = 0 : i64, scratch_operands = 1 : i64, tpu.core_type = #tpu.core_type<tc>, window_params = [{pipeline_mode = #tpu.pipeline_mode<synchronous>, transform_indices = @transform_0, window_bounds = array<i64: 8, 32>}, {transform_indices = @transform_1, window_bounds = array<i64: 32, 128>}, {transform_indices = @transform_2, window_bounds = array<i64: 1, 128>}, {transform_indices = @transform_3, window_bounds = array<i64: 1, 128>}, {transform_indices = @transform_4, window_bounds = array<i64: 1, 128>}, {transform_indices = @transform_5, window_bounds = array<i64: 128, 128>}, {pipeline_mode = #tpu.pipeline_mode<synchronous>, transform_indices = @transform_6, window_bounds = array<i64: 1, 128>}, {pipeline_mode = #tpu.pipeline_mode<synchronous>, transform_indices = @transform_7, window_bounds = array<i64: 8, 128>}]} {
    %c0 = arith.constant 0 : index
    %c0_0 = arith.constant 0 : index
    %0 = vector.load %arg1[%c0, %c0_0] : memref<8x32xbf16, #tpu.memory_space<vmem>>, vector<8x32xbf16>
    %c0_1 = arith.constant 0 : index
    %c0_2 = arith.constant 0 : index
    %1 = vector.load %arg2[%c0_1, %c0_2] : memref<32x128xbf16, #tpu.memory_space<vmem>>, vector<32x128xbf16>
    %cst = arith.constant dense<0.000000e+00> : vector<8x128xf32>
    %2 = tpu.matmul %0, %1, %cst {dimension_numbers = #tpu.dot_dimension_numbers<[1], [0], [0], [1], [0, 0, 1, 1], [], []>} : vector<8x32xbf16>, vector<32x128xbf16>, vector<8x128xf32> -> vector<8x128xf32>
    %c0_3 = arith.constant 0 : index
    %c0_4 = arith.constant 0 : index
    %3 = vector.load %arg3[%c0_3, %c0_4] : memref<1x128xf32, #tpu.memory_space<vmem>>, vector<1x128xf32>
    %4 = vector.broadcast %3 : vector<1x128xf32> to vector<8x128xf32>
    %5 = arith.addf %2, %4 : vector<8x128xf32>
    %cst_5 = arith.constant dense<0.000000e+00> : vector<128xf32>
    %6 = vector.multi_reduction <add>, %5, %cst_5 [0] : vector<8x128xf32> to vector<128xf32>
    %7 = vector.shape_cast %6 : vector<128xf32> to vector<1x128xf32>
    %cst_6 = arith.constant 1.250000e-01 : f32
    %8 = vector.broadcast %cst_6 : f32 to vector<1x128xf32>
    %9 = arith.mulf %7, %8 : vector<1x128xf32>
    %10 = arith.mulf %5, %5 : vector<8x128xf32>
    %cst_7 = arith.constant dense<0.000000e+00> : vector<128xf32>
    %11 = vector.multi_reduction <add>, %10, %cst_7 [0] : vector<8x128xf32> to vector<128xf32>
    %12 = vector.shape_cast %11 : vector<128xf32> to vector<1x128xf32>
    %cst_8 = arith.constant 1.250000e-01 : f32
    %13 = vector.broadcast %cst_8 : f32 to vector<1x128xf32>
    %14 = arith.mulf %12, %13 : vector<1x128xf32>
    %15 = arith.mulf %9, %9 : vector<1x128xf32>
    %16 = arith.subf %14, %15 : vector<1x128xf32>
    %cst_9 = arith.constant 9.99999974E-6 : f32
    %17 = vector.broadcast %cst_9 : f32 to vector<1x128xf32>
    %18 = arith.addf %16, %17 : vector<1x128xf32>
    %19 = math.rsqrt %18 : vector<1x128xf32>
    %c0_10 = arith.constant 0 : index
    %c0_11 = arith.constant 0 : index
    %20 = vector.load %arg4[%c0_10, %c0_11] : memref<1x128xf32, #tpu.memory_space<vmem>>, vector<1x128xf32>
    %21 = arith.mulf %19, %20 : vector<1x128xf32>
    %c0_12 = arith.constant 0 : index
    %c0_13 = arith.constant 0 : index
    %22 = vector.load %arg5[%c0_12, %c0_13] : memref<1x128xf32, #tpu.memory_space<vmem>>, vector<1x128xf32>
    %23 = arith.mulf %9, %21 : vector<1x128xf32>
    %24 = arith.subf %22, %23 : vector<1x128xf32>
    %25 = vector.broadcast %21 : vector<1x128xf32> to vector<8x128xf32>
    %26 = arith.mulf %5, %25 : vector<8x128xf32>
    %27 = vector.broadcast %24 : vector<1x128xf32> to vector<8x128xf32>
    %28 = arith.addf %26, %27 : vector<8x128xf32>
    %cst_14 = arith.constant 0.000000e+00 : f32
    %29 = vector.broadcast %cst_14 : f32 to vector<8x128xf32>
    %30 = arith.maximumf %28, %29 : vector<8x128xf32>
    %c0_i32 = arith.constant 0 : i32
    %31 = arith.cmpi eq, %arg0, %c0_i32 : i32
    %32 = arith.extui %31 : i1 to i32
    %c0_i32_15 = arith.constant 0 : i32
    %33 = arith.cmpi ne, %32, %c0_i32_15 : i32
    scf.if %33 {
      %cst_24 = arith.constant 0.000000e+00 : f32
      %43 = vector.broadcast %cst_24 : f32 to vector<8x128xf32>
      %c0_25 = arith.constant 0 : index
      %c0_26 = arith.constant 0 : index
      %44 = vector.load %arg9[%c0_25, %c0_26] : memref<8x128xf32, #tpu.memory_space<vmem>>, vector<8x128xf32>
      tpu.vector_store %arg9[%c0_25, %c0_26], %43 {strides = array<i32>} : memref<8x128xf32, #tpu.memory_space<vmem>>, vector<8x128xf32>,
    } else {
    }
    %c0_16 = arith.constant 0 : index
    %c0_17 = arith.constant 0 : index
    %34 = vector.load %arg9[%c0_16, %c0_17] : memref<8x128xf32, #tpu.memory_space<vmem>>, vector<8x128xf32>
    %35 = arith.truncf %30 : vector<8x128xf32> to vector<8x128xbf16>
    %c0_18 = arith.constant 0 : index
    %c0_19 = arith.constant 0 : index
    %36 = vector.load %arg6[%c0_18, %c0_19] : memref<128x128xbf16, #tpu.memory_space<vmem>>, vector<128x128xbf16>
    %cst_20 = arith.constant dense<0.000000e+00> : vector<8x128xf32>
    %37 = tpu.matmul %35, %36, %cst_20 {dimension_numbers = #tpu.dot_dimension_numbers<[1], [0], [0], [1], [0, 0, 1, 1], [], []>} : vector<8x128xbf16>, vector<128x128xbf16>, vector<8x128xf32> -> vector<8x128xf32>
    %38 = arith.addf %34, %37 : vector<8x128xf32>
    %c0_21 = arith.constant 0 : index
    %c0_22 = arith.constant 0 : index
    %39 = vector.load %arg9[%c0_21, %c0_22] : memref<8x128xf32, #tpu.memory_space<vmem>>, vector<8x128xf32>
    tpu.vector_store %arg9[%c0_21, %c0_22], %38 {strides = array<i32>} : memref<8x128xf32, #tpu.memory_space<vmem>>, vector<8x128xf32>,
    %c1_i32 = arith.constant 1 : i32
    %40 = arith.cmpi eq, %arg0, %c1_i32 : i32
    %41 = arith.extui %40 : i1 to i32
    %c0_i32_23 = arith.constant 0 : i32
    %42 = arith.cmpi ne, %41, %c0_i32_23 : i32
    scf.if %42 {
      %c0_24 = arith.constant 0 : index
      %c0_25 = arith.constant 0 : index
      %43 = vector.load %arg9[%c0_24, %c0_25] : memref<8x128xf32, #tpu.memory_space<vmem>>, vector<8x128xf32>
      %c0_26 = arith.constant 0 : index
      %c0_27 = arith.constant 0 : index
      %44 = vector.load %arg7[%c0_26, %c0_27] : memref<1x128xf32, #tpu.memory_space<vmem>>, vector<1x128xf32>
      %45 = vector.broadcast %44 : vector<1x128xf32> to vector<8x128xf32>
      %46 = arith.addf %43, %45 : vector<8x128xf32>
      %c0_28 = arith.constant 0 : index
      %c0_29 = arith.constant 0 : index
      %47 = vector.load %arg8[%c0_28, %c0_29] : memref<8x128xf32, #tpu.memory_space<vmem>>, vector<8x128xf32>
      tpu.vector_store %arg8[%c0_28, %c0_29], %46 {strides = array<i32>} : memref<8x128xf32, #tpu.memory_space<vmem>>, vector<8x128xf32>,
    } else {
    }
    return
  }
  func.func @transform_0(%arg0: i32) -> (i32, i32) {
    %c0_i32 = arith.constant 0 : i32
    %c0_i32_0 = arith.constant 0 : i32
    %c0_i32_1 = arith.constant 0 : i32
    return %c0_i32, %c0_i32_0 : i32, i32
  }
  func.func @transform_1(%arg0: i32) -> (i32, i32) {
    %c0_i32 = arith.constant 0 : i32
    %c0_i32_0 = arith.constant 0 : i32
    return %c0_i32, %arg0 : i32, i32
  }
  func.func @transform_2(%arg0: i32) -> (i32, i32) {
    %c0_i32 = arith.constant 0 : i32
    %c0_i32_0 = arith.constant 0 : i32
    return %c0_i32, %arg0 : i32, i32
  }
  func.func @transform_3(%arg0: i32) -> (i32, i32) {
    %c0_i32 = arith.constant 0 : i32
    %c0_i32_0 = arith.constant 0 : i32
    return %c0_i32, %arg0 : i32, i32
  }
  func.func @transform_4(%arg0: i32) -> (i32, i32) {
    %c0_i32 = arith.constant 0 : i32
    %c0_i32_0 = arith.constant 0 : i32
    return %c0_i32, %arg0 : i32, i32
  }
  func.func @transform_5(%arg0: i32) -> (i32, i32) {
    %c0_i32 = arith.constant 0 : i32
    %c0_i32_0 = arith.constant 0 : i32
    return %arg0, %c0_i32 : i32, i32
  }
  func.func @transform_6(%arg0: i32) -> (i32, i32) {
    %c0_i32 = arith.constant 0 : i32
    %c0_i32_0 = arith.constant 0 : i32
    %c0_i32_1 = arith.constant 0 : i32
    return %c0_i32, %c0_i32_0 : i32, i32
  }
  func.func @transform_7(%arg0: i32) -> (i32, i32) {
    %c0_i32 = arith.constant 0 : i32
    %c0_i32_0 = arith.constant 0 : i32
    %c0_i32_1 = arith.constant 0 : i32
    return %c0_i32, %c0_i32_0 : i32, i32
  }
}

</mosaic_0001>

<bundles_post_ra>
// kernel: tpu_custom_call.1
= control target key start
LH: loop header
LB: loop body
LE: loop exit
PB: predicated region body
PF: predicated region fallthrough
CT: control target
= control target key end

     0   :  { %s1362_s0 = inlined_call_operand.hbm [shape: bf16[8,32], index: 0, kind: input, shape index: {}]   ;;  %s1363_s1 = inlined_call_operand.hbm [shape: bf16[32,256], index: 1, kind: input, shape index: {}]   ;;  %s1364_s2 = inlined_call_operand.hbm [shape: f32[1,256], index: 2, kind: input, shape index: {}]   ;;  %s1365_s3 = inlined_call_operand.vmem [shape: f32[1,256], index: 3, kind: input, shape index: {}]   ;;  %s1366_s4 = inlined_call_operand.hbm [shape: f32[1,256], index: 4, kind: input, shape index: {}]   ;;  %s1367_s5 = inlined_call_operand.hbm [shape: bf16[256,128], index: 5, kind: input, shape index: {}]   ;;  %s1368_s6 = inlined_call_operand.vmem [shape: f32[1,128], index: 6, kind: input, shape index: {}]   ;;  %s1369_s7 = inlined_call_operand.hbm [shape: f32[8,128], index: 7, kind: output, shape index: {}]  }
   0x1   :  { %1372 = sst [smem:[#allocation17_spill]] %s1362_s0 }
   0x2   :  { %1373 = sst [smem:[#allocation18_spill]] %s1363_s1 }
   0x3   :  { %12 = vsyncpa [#allocation4], 0 }
   0x4   :  { %13 = vsyncpa [#allocation7], 0 }
   0x5   :  { %15 = vsyncpa [#allocation7 + $0x1], 0 }
   0x6   :  { %16 = vsyncpa [#allocation10], 0 }
   0x7   :  { %18 = vsyncpa [#allocation10 + $0x1], 0 }
   0x8   :  { %19 = vsyncpa [#allocation5], 0  ;;  %s1156_s24 = smov 0   ;;  %s1158_s25 = smov 0  }
   0x9   :  { %s1160_s26 = smov 0   ;;  %s1162_s27 = smov 0  }
   0xa LB: > { %s1177_s28 = sadd.s32 1, %s1108_s27   ;;  %s53_s29 = sadd.s32 1, %s1104_s26  ;;  %s1108_s27 = sphi %s1162_s27, %s1384_s27   ;;  %s1104_s26 = sphi %s1160_s26, %s1383_s26   ;;  %s1100_s25 = sphi %s1158_s25, %s1382_s25   ;;  %s1096_s24 = sphi %s1156_s24, %s1381_s24  }
   0xb   : > { %s50_s30 = ssub.s32 %s1108_s27, %s1177_s28  ;;  %p60_p0 = scmp.ne.s32.totalorder %s1104_s26, %s1100_s25 }
   0xc   : > { %p51_p1 = scmp.eq.s32.totalorder %s50_s30, 0  ;;  %p61_p2 = scmp.eq.s32.totalorder %s1108_s27, 0 }
   0xd   : > { %p838_p3 = scmp.lt.s32.totalorder %s1108_s27, 2  ;;  %s251_s9 = sand.u32 1, %s1108_s27  }
   0xe   : > { %s1187_s8 = scalar_select %p51_p1, %s1104_s26, %s53_s29  }
   0xf   : > { %p62_p4 = por %p61_p2, %p60_p0  ;;  %s1191_s10 = sand.u32 1, %s1104_s26  }
  0x10   : > { %s737_s11 = sshll.u32 %s1191_s10, 4  ;;  %s738_s12 = sshll.u32 %s1108_s27, 2 }
  0x11   : > { %s1374_s1 = sld [smem:[#allocation18_spill]]  ;;  %s255_s17 = scalar_lea.vmem [#allocation6], %s737_s11 }
  0x12   : > { %s262_s18 = sshll.u32 %s255_s17, 4  ;;  %p1200_p5 = pnand %p838_p3, %p62_p4  ;;  %s263_s18 = int_to_ptr.vmem [resolvable:$true] %s262_s18 }
  0x13   : > { %s1206_s20 = scalar_lea.sflag [#allocation7], %s251_s9 }
  0x14   : > { %p888_p7 = pneg %p1200_p5 }
  0x17   : > { %s259_s15 = scalar_lea.hbm %s1374_s1, %s738_s12  ;;  %s891_s30 = scalar_lea.hbm %s1374_s1, 32 }
  0x18   : > { %s260_s16 = sshll.u32 %s259_s15, 4  ;;  %s261_s16 = int_to_ptr.hbm [resolvable:$true] %s260_s16 }
  0x19   : > { %s884_s21 = sshra.s32 %s261_s16, 4  ;;  %s885_s21 = int_to_ptr.hbm [resolvable:$true] %s884_s21 }
  0x1a   : > { %s886_s22 = scalar_lea.hbm %s885_s21, 16  ;;  %p892_p10 = scmp.lt.s32.totalorder %s885_s21, %s1374_s1 }
  0x1b   : > { %p887_p6 = scmp.ne.s32.totalorder %s885_s21, %s886_s22  ;;  %p893_p11 = scmp.lt.s32.totalorder %s891_s30, %s886_s22 }
  0x1d   : > { %p889_p8 = pnand %p888_p7, %p887_p6  ;;  %p894_p12 = por %p893_p11, %p892_p10 }
  0x1f   : > { %p890_p9 = pneg %p889_p8 }
  0x21   : > { %p895_p13 = pnand %p894_p12, %p890_p9 }
  0x23   : > { %898 = shalt.err (!%p895_p13)
}
  0x24   : > { %s1110_s13 = smov 128   ;;  %s1370_s14 = smov 64  }
  0x25   : > { %s1371_s15 = smov 4   ;;  %s301_s21 = scalar_lea.hbm %s1366_s4, %s1108_s27 }
  0x26   : > { %827 = dma.hbm_to_vmem [thread:$0]  (!%p1200_p5), %s261_s16, 256, %s263_s18, %s1206_s20, %s1110_s13, %s1370_s14, %s1371_s15  }
  0x27   : > { %s303_s22 = sshll.u32 %s301_s21, 4  ;;  %s298_s29 = scalar_lea.vmem [#allocation9], %s1191_s10  ;;  %s304_s22 = int_to_ptr.hbm [resolvable:$true] %s303_s22 }
  0x28   : > { %s305_s30 = sshll.u32 %s298_s29, 4  ;;  %s1231_s11 = scalar_lea.sflag [#allocation10], %s251_s9  ;;  %s306_s30 = int_to_ptr.vmem [resolvable:$true] %s305_s30 }
  0x29   : > { %s914_s12 = sshra.s32 %s304_s22, 4  ;;  %s921_s13 = scalar_lea.hbm %s1366_s4, 2  ;;  %s915_s12 = int_to_ptr.hbm [resolvable:$true] %s914_s12 }
  0x2a   : > { %s916_s1 = scalar_lea.hbm %s915_s12, 1  ;;  %p922_p3 = scmp.lt.s32.totalorder %s915_s12, %s1366_s4 }
  0x2b   : > { %p917_p0 = scmp.ne.s32.totalorder %s915_s12, %s916_s1  ;;  %p923_p4 = scmp.lt.s32.totalorder %s921_s13, %s916_s1 }
  0x2d   : > { %p919_p1 = pnand %p917_p0, %p888_p7  ;;  %p924_p6 = por %p923_p4, %p922_p3 }
  0x2f   : > { %p920_p2 = pneg %p919_p1 }
  0x31   : > { %p925_p8 = pnand %p924_p6, %p920_p2 }
  0x33   : > { %928 = shalt.err (!%p925_p8)
}
  0x34   : > { %833 = dma.hbm_to_vmem [thread:$0]  (!%p1200_p5), %s304_s22, 16, %s306_s30, %s1231_s11  }
  0x35   : > { %s1246_s9 = sadd.s32 4294967295, %s1108_s27   ;;  %p66_p10 = scmp.ne.s32.totalorder %s1100_s25, %s1096_s24 }
  0x36   : > { %p67_p9 = scmp.eq.s32.totalorder %s1246_s9, 0  ;;  %p734_p11 = scmp.ge.s32.totalorder %s1108_s27, 1 }
  0x37   : > { %p223_p12 = scmp.lt.s32.totalorder %s1108_s27, 3  ;;  %p735_p13 = scmp.ne.s32.totalorder %s1246_s9, 0 }
  0x38   : > { %p1256_p0 = por %p67_p9, %p66_p10  ;;  %s1377_s0 = sld [smem:[#allocation17_spill]] }
  0x39   : > { %p1263_p1 = pnand %p734_p11, %p223_p12  ;;  %s1113_s24 = smov [#allocation3]  }
  0x3a   : > { %s237_s12 = sshll.u32 %s1113_s24, 4  ;;  %s278_s13 = scalar_lea.hbm %s1364_s2, %s1108_s27  ;;  %s238_s12 = int_to_ptr.vmem [resolvable:$true] %s237_s12 }
  0x3b   : > { %p820_p2 = pneg %p1263_p1  ;;  %s280_s17 = sshll.u32 %s278_s13, 4  ;;  %s281_s17 = int_to_ptr.hbm [resolvable:$true] %s280_s17 }
  0x3c   : > { %s275_s23 = scalar_lea.vmem [#allocation8], %s1191_s10  ;;  %s974_s29 = sshra.s32 %s281_s17, 4  ;;  %s975_s29 = int_to_ptr.hbm [resolvable:$true] %s974_s29 }
  0x3d   : > { %p821_p3 = pnand %p820_p2, %p67_p9  ;;  %s282_s21 = sshll.u32 %s275_s23, 4  ;;  %s283_s21 = int_to_ptr.vmem [resolvable:$true] %s282_s21 }
  0x3e   : > { %s235_s22 = sshll.u32 %s1377_s0, 4  ;;  %s976_s14 = scalar_lea.hbm %s975_s29, 1  ;;  %s236_s22 = int_to_ptr.hbm [resolvable:$true] %s235_s22 }
  0x3f   : > { %823 = dma.hbm_to_vmem [thread:$0]  (!%p821_p3), %s236_s22, 64, %s238_s12, [#allocation4]  }
  0x40   : > { %p977_p4 = scmp.ne.s32.totalorder %s975_s29, %s976_s14  ;;  %s981_s16 = scalar_lea.hbm %s1364_s2, 2 }
  0x41   : > { %p982_p10 = scmp.lt.s32.totalorder %s975_s29, %s1364_s2  ;;  %p983_p11 = scmp.lt.s32.totalorder %s981_s16, %s976_s14 }
  0x42   : > { %p979_p6 = pnand %p977_p4, %p888_p7 }
  0x43   : > { %p984_p12 = por %p983_p11, %p982_p10 }
  0x44   : > { %p980_p8 = pneg %p979_p6 }
  0x46   : > { %p985_p2 = pnand %p984_p12, %p980_p8 }
  0x48   : > { %988 = shalt.err (!%p985_p2)
}
  0x49   : > { %830 = dma.hbm_to_vmem [thread:$0]  (!%p1200_p5), %s281_s17, 16, %s283_s21, %s1206_s20  }
  0x4a   : > { %s739_s22 = sshll.u32 %s1191_s10, 6  ;;  %s793_s12 = sshll.u32 %s1108_s27, 6 }
  0x4b   : > { %s321_s23 = scalar_lea.hbm %s1367_s5, %s793_s12  ;;  %s316_s0 = scalar_lea.vmem [#allocation11], %s739_s22 }
  0x4c   : > { %s322_s24 = sshll.u32 %s321_s23, 4  ;;  %s324_s29 = sshll.u32 %s316_s0, 4  ;;  %s323_s24 = int_to_ptr.hbm [resolvable:$true] %s322_s24  ;;  %s325_s29 = int_to_ptr.vmem [resolvable:$true] %s324_s29 }
  0x4d   : > { %s1004_s14 = sshra.s32 %s323_s24, 4  ;;  %s1011_s27 = scalar_lea.hbm %s1367_s5, 128  ;;  %s1005_s14 = int_to_ptr.hbm [resolvable:$true] %s1004_s14 }
  0x4e   : > { %s1006_s16 = scalar_lea.hbm %s1005_s14, 64  ;;  %p1012_p8 = scmp.lt.s32.totalorder %s1005_s14, %s1367_s5 }
  0x4f   : > { %p1007_p3 = scmp.ne.s32.totalorder %s1005_s14, %s1006_s16  ;;  %p1013_p10 = scmp.lt.s32.totalorder %s1011_s27, %s1006_s16 }
  0x51   : > { %p1009_p4 = pnand %p1007_p3, %p888_p7  ;;  %p1014_p11 = por %p1013_p10, %p1012_p8 }
  0x53   : > { %p1010_p6 = pneg %p1009_p4 }
  0x55   : > { %p1015_p12 = pnand %p1014_p11, %p1010_p6 }
  0x57   : > { %1018 = shalt.err (!%p1015_p12)
}
  0x58   : > { %s1379_s18 = smov 4   ;;  %s1380_s22 = smov 64  }
  0x59   : > { %836 = dma.hbm_to_vmem [thread:$0]  (!%p1200_p5), %s323_s24, 1024, %s325_s29, %s1231_s11, %s1380_s22, %s1380_s22, %s1379_s18  }
  0x5a   : > { %336 = sbr.rel (%p1263_p1) target bundleno = 466 (0x1d2), region = 48 }
  0x5f   : > { %1079 = dma.done.wait (%p67_p9), [#allocation4], 64  }
  0x60   : > { %1081 = vsyncadd (%p67_p9), [#allocation4], 4294967232  ;;  %s343_s12 = sand.u32 1, %s1246_s9   ;;  %s1316_s13 = sand.u32 1, %s1100_s25  }
  0x61   : > { %s744_s19 = sshll.u32 %s1316_s13, 4  ;;  %s344_s15 = scalar_lea.sflag [#allocation7], %s343_s12 }
  0x62   : > { %s347_s23 = scalar_lea.vmem [#allocation6], %s744_s19 }
  0x63   : > { %1083 = dma.done.wait (%p1256_p0), %s344_s15, 272  }
  0x64   : > { %1085 = vsyncadd (%p1256_p0), %s344_s15, 4294967024  ;;  %s356_s11 = scalar_lea.vmem [#allocation8], %s1316_s13  ;;  %s363_s30 = scalar_lea.sflag [#allocation10], %s343_s12 }
  0x65   : > { %s365_s24 = scalar_lea.vmem [#allocation9], %s1316_s13 }
  0x66   : > { %1087 = dma.done.wait (%p1256_p0), %s363_s30, 1040  }
  0x67   : > { %1089 = vsyncadd (%p1256_p0), %s363_s30, 4294966256  ;;  %s745_s0 = sshll.u32 %s1316_s13, 6  ;;  %v795_v0 = vld [vmem:[%s347_s23 + $0x8] sm:$0xff]  ;;  %v794_v1 = vld [vmem:[%s347_s23] sm:$0xff]  ;;  %vm444_vm0 = vcmask 261120   ;;  %p418_p5 = scmp.lt.s32.totalorder %s1246_s9, 1 }
  0x68   : > { %454 = vmatpush.bf16.msra.mxu0 %v795_v0  ;;  %v423_v2 = vld [vmem:[#allocation3] sm:$0xf]  ;;  %v880_v3 = vld [vmem:[%s356_s11] ss:$0 sm:$0xff]  ;;  %s375_s20 = scalar_lea.vmem [#allocation11], %s745_s0 }
  0x69   : > { %s419_s1 = scalar_select %p418_p5, %s1246_s9, 1  ;;  %v491_v34 = vld [vmem:[%s365_s24] sm:$0x1] }
  0x6b   : > { %s420_s16 = scalar_lea.vmem %s1365_s3, %s419_s1 }
  0x6c   : > { %455 = vmatpush.bf16.msra.mxu0 %v794_v1  ;;  %v489_v31 = vld [vmem:[%s420_s16] sm:$0x1] }
  0x6f   : > { %754 = vmatmul.msk.bf16.vlgmr.msra.gmra.mxu0 %vm444_vm0, %v423_v2 }
  0xec   : > { %v457_v4 = vpop.f32.mrf.mxu0 }
  0xed   : > { %v458_v5 = vadd.f32 %v880_v3, %v457_v4 }
  0xef   : > { %v461_v6 = vrot.slane %v458_v5, 4  ;;  %v468_v7 = vmul.f32 %v458_v5, %v458_v5 }
  0xf1   : > { %v462_v8 = vadd.f32 %v461_v6, %v458_v5  ;;  %v469_v9 = vrot.slane %v468_v7, 4 }
  0xf3   : > { %v463_v10 = vrot.slane %v462_v8, 2  ;;  %v470_v11 = vadd.f32 %v469_v9, %v468_v7 }
  0xf4   : > { %v459_v12 = vpop.f32.mrf.mxu0 }
  0xf5   : > { %v464_v13 = vadd.f32 %v463_v10, %v462_v8  ;;  %v471_v14 = vrot.slane %v470_v11, 2 }
  0xf7   : > { %v465_v15 = vrot.slane %v464_v13, 1  ;;  %v472_v16 = vadd.f32 %v471_v14, %v470_v11 }
  0xf9   : > { %v466_v17 = vadd.f32 %v465_v15, %v464_v13  ;;  %v473_v18 = vrot.slane %v472_v16, 1 }
  0xfb   : > { %v467_v19 = vmul.f32 0.125, %v466_v17  ;;  %v474_v20 = vadd.f32 %v473_v18, %v472_v16 }
  0xfd   : > { %v475_v21 = vmul.f32 0.125, %v474_v20  ;;  %v476_v22 = vmul.f32 %v467_v19, %v467_v19 }
  0xff   : > { %v477_v23 = vsub.f32 %v475_v21, %v476_v22 }
 0x101   : > { %v478_v24 = vadd.f32 1e-05, %v477_v23 }
 0x103   : > { %881 = vrsqrt.f32 %v478_v24  ;;  %vm485_vm2 = vweird.f32 %v478_v24 }
 0x109   : > { %v882_v25 = vpop.eup %881 }
 0x10a   : > { %v480_v26 = vmul.f32 %v882_v25, %v478_v24  ;;  %vm486_vm1 = vweird.f32 %v882_v25 }
 0x10b   : > { %vm487_vm3 = vmor %vm485_vm2, %vm486_vm1 }
 0x10c   : > { %v481_v27 = vmul.f32 %v882_v25, %v480_v26 }
 0x10e   : > { %v482_v28 = vmul.f32 0.5, %v481_v27 }
 0x110   : > { %v483_v29 = vsub.f32 1.5, %v482_v28 }
 0x112   : > { %v484_v30 = vmul.f32 %v882_v25, %v483_v29 }
 0x114   : > { %v488_v32 = vsel %vm487_vm3, %v882_v25, %v484_v30 }
 0x115   : > { %v490_v33 = vmul.f32 %v489_v31, %v488_v32 }
 0x117   : > { %v492_v35 = vmul.f32 %v490_v33, %v467_v19  ;;  %v494_v36 = vperm.slane %v490_v33, 0 }
 0x119   : > { %v493_v37 = vsub.f32 %v491_v34, %v492_v35  ;;  %v495_v38 = vmul.f32 %v494_v36, %v458_v5 }
 0x11b   : > { %v497_v39 = vperm.slane %v493_v37, 0  ;;  %504 = sbr.rel (%p735_p13) target bundleno = 290 (0x122), region = 72 }
 0x11d   : > { %v499_v40 = vadd.f32 %v497_v39, %v495_v38 }
 0x11f   : > { %v500_v41 = vmax.f32 %v499_v40, 0.0 }
 0x120   : > { %v1114_v42 = vmov 0.0  }
 0x121   : > { %505 = vst [vmem:[#allocation2] sm:$0xff] %v1114_v42 }
 0x122 PF: > { %v803_v43 = vld [vmem:[%s375_s20 + $0x38] sm:$0xff]  ;;  %v802_v44 = vld [vmem:[%s375_s20 + $0x30] sm:$0xff]  ;;  %v801_v45 = vld [vmem:[%s375_s20 + $0x28] sm:$0xff]  ;;  %v507_v51 = vpack.c.bf16 %v500_v41, %v500_v41  ;;  %p788_p7 = scmp.ne.s32.totalorder %s1246_s9, 1 }
 0x123   : > { %572 = vmatpush.bf16.msra.mxu1 %v803_v43  ;;  %v800_v46 = vld [vmem:[%s375_s20 + $0x20] sm:$0xff]  ;;  %v799_v47 = vld [vmem:[%s375_s20 + $0x18] sm:$0xff]  ;;  %v798_v48 = vld [vmem:[%s375_s20 + $0x10] sm:$0xff] }
 0x124   : > { %v797_v49 = vld [vmem:[%s375_s20 + $0x8] sm:$0xff]  ;;  %v796_v50 = vld [vmem:[%s375_s20] sm:$0xff] }
 0x127   : > { %573 = vmatpush.bf16.msra.mxu1 %v802_v44 }
 0x128   : > { %v506_v52 = vld [vmem:[#allocation2] sm:$0xff] }
 0x12b   : > { %574 = vmatpush.bf16.msra.mxu1 %v801_v45 }
 0x12f   : > { %575 = vmatpush.bf16.msra.mxu1 %v800_v46 }
 0x133   : > { %576 = vmatpush.bf16.msra.mxu1 %v799_v47 }
 0x137   : > { %577 = vmatpush.bf16.msra.mxu1 %v798_v48 }
 0x13b   : > { %578 = vmatpush.bf16.msra.mxu1 %v797_v49 }
 0x13f   : > { %579 = vmatpush.bf16.msra.mxu1 %v796_v50 }
 0x142   : > { %580 = vmatmul.bf16.vlgmr.msra.gmra.mxu1 %v507_v51 }
 0x1bf   : > { %v581_v53 = vpop.f32.mrf.mxu1 }
 0x1c0   : > { %v585_v54 = vadd.f32 %v581_v53, %v506_v52 }
 0x1c2   : > { %586 = vst [vmem:[#allocation2] sm:$0xff] %v585_v54 }
 0x1c3   : > { %590 = sbr.rel (%p788_p7) target bundleno = 461 (0x1cd), region = 76 }
 0x1c7   : > { %v583_v55 = vpop.f32.mrf.mxu1 }
 0x1c8   : > { %v883_v57 = vld [vmem:[%s1368_s6] ss:$0 sm:$0xff] }
 0x1c9   : > { %v591_v56 = vld [vmem:[#allocation2] sm:$0xff] }
 0x1ca   : > { %v596_v58 = vadd.f32 %v883_v57, %v591_v56 }
 0x1cc   : > { %597 = vst [vmem:[#allocation12] sm:$0xff] %v596_v58 }
 0x1cd PF: > { %p840_p9 = scmp.eq.s32.totalorder %s1246_s9, 1  ;;  %s1115_s17 = smov [#allocation12]  }
 0x1ce   : > { %s604_s21 = sshll.u32 %s1115_s17, 4  ;;  %s606_s12 = sshll.u32 %s1369_s7, 4  ;;  %s605_s21 = int_to_ptr.vmem [resolvable:$true] %s604_s21  ;;  %s607_s12 = int_to_ptr.hbm [resolvable:$true] %s606_s12 }
 0x1cf   : > { %817 = dma.vmem_to_hbm [thread:$0]  (%p840_p9), %s605_s21, 128, %s607_s12, [#allocation5]  }
 0x1d0   : > { %1091 = dma.done.wait (%p840_p9), [#allocation5], 128  }
 0x1d1   : > { %1093 = vsyncadd (%p840_p9), [#allocation5], 4294967168 }
 0x1d2 PF: > { %p22_p13 = scmp.ge.s32.totalorder %s1177_s28, 4   ;;  %s1381_s24 = smov %s1100_s25 }
 0x1d3   : > { %s1382_s25 = smov %s1104_s26  ;;  %s1383_s26 = smov %s1187_s8 }
 0x1d4   : > { %s1384_s27 = smov %s1177_s28  ;;  %24 = sbr.rel (!%p22_p13) target bundleno = 10 (0xa), region = 136 }
 0x1d9   :  { %620 = vsyncpa [#allocation4], 1 }
 0x1da   :  { %622 = vsyncpa [#allocation4 + $0x1], 1 }
 0x1db   :  { %623 = vsyncpa [#allocation7], 1 }
 0x1dc   :  { %625 = vsyncpa [#allocation7 + $0x1], 1 }
 0x1dd   :  { %626 = vsyncpa [#allocation10], 1 }
 0x1de   :  { %628 = vsyncpa [#allocation10 + $0x1], 1 }
 0x1df   :  { %629 = vsyncpa [#allocation5], 1 }
 0x1e0   :  { %631 = vsyncpa [#allocation5 + $0x1], 1 }

</bundles_post_ra>
